<compile_context>
chip_gen: v7x
topology: tpu7x:2x2x1
jax: 0.10.0
libtpu: 0.0.40
codegen_flags: <defaults>
</compile_context>

<pallas_src>
import functools
from typing import NamedTuple

import jax
import jax.numpy as jnp
from jax.experimental import pallas as pl
from jax.experimental.pallas import tpu as pltpu


def _round_up(x, m):
    return ((x + m - 1) // m) * m


# ----------------------------------------------------------------------------
# Parameter preparation (pad + cast ONCE, not on every forward call).
# ----------------------------------------------------------------------------
class ProjectionHeadParams(NamedTuple):
    w1: jax.Array   # [E_p, E_p]  compute dtype
    b1: jax.Array   # [1,  E_p]   f32
    w2: jax.Array   # [E_p, H_p]  compute dtype
    b2: jax.Array   # [1,  H_p]   f32
    head: int       # un-padded head size (static python int)


def prepare_projection_head_params(w1, b1, w2, b2, compute_dtype=jnp.bfloat16):
    """Pads feature axes to 128-lane multiples and casts to the MXU dtype.

    w1: [E, E], b1: [E], w2: [E, H], b2: [H]  (already [in, out] layout).
    Zero padding is semantics preserving: padded input features hit zero W1
    rows; padded hidden units have zero weight+bias so relu(.)=0; padded output
    columns are sliced off by the caller.
    """
    E = w1.shape[0]
    H = w2.shape[1]
    E_p = _round_up(E, 128)
    H_p = _round_up(H, 128)
    w1_p = jnp.pad(w1, ((0, E_p - E), (0, E_p - E))).astype(compute_dtype)
    w2_p = jnp.pad(w2, ((0, E_p - E), (0, H_p - H))).astype(compute_dtype)
    b1_p = jnp.pad(b1, (0, E_p - E)).astype(jnp.float32).reshape(1, E_p)
    b2_p = jnp.pad(b2, (0, H_p - H)).astype(jnp.float32).reshape(1, H_p)
    return ProjectionHeadParams(w1_p, b1_p, w2_p, b2_p, head=int(H))


# ----------------------------------------------------------------------------
# Kernels
# ----------------------------------------------------------------------------
def _proj_head_resident_kernel(h_ref, w1_ref, b1_ref, w2_ref, b2_ref, o_ref):
    # hidden = relu(h @ W1 + b1); f32 MXU accumulation, f32 epilogue.
    h1 = jnp.dot(h_ref[...], w1_ref[...], preferred_element_type=jnp.float32)
    h1 = jnp.maximum(h1 + b1_ref[...], 0.0)          # b1 is (1, E_p) -> broadcasts
    out = jnp.dot(h1.astype(w2_ref.dtype), w2_ref[...],
                  preferred_element_type=jnp.float32)
    o_ref[...] = (out + b2_ref[...]).astype(o_ref.dtype)


def _proj_head_stream_kernel(h_ref, w1_ref, b1_ref, w2_ref, b2_ref, o_ref, acc_ref):
    # Hidden axis tiled: this step sees W1[:, k-block], b1[k-block], W2[k-block, :].
    k = pl.program_id(1)

    @pl.when(k == 0)
    def _():
        acc_ref[...] = jnp.zeros_like(acc_ref)

    h1 = jnp.dot(h_ref[...], w1_ref[...], preferred_element_type=jnp.float32)
    h1 = jnp.maximum(h1 + b1_ref[...], 0.0)
    acc_ref[...] += jnp.dot(h1.astype(w2_ref.dtype), w2_ref[...],
                            preferred_element_type=jnp.float32)

    @pl.when(k == pl.num_programs(1) - 1)
    def _():
        o_ref[...] = (acc_ref[...] + b2_ref[...]).astype(o_ref.dtype)


# ----------------------------------------------------------------------------
# Wrapper
# ----------------------------------------------------------------------------
def _vmem_budget_bytes():
    capacity = 64 << 20                      # conservative fallback (v7x per-TC)
    try:
        capacity = int(pltpu.get_tpu_info().vmem_capacity_bytes)
    except Exception:
        pass
    # Leave headroom for Mosaic internal scratch / semaphores / double buffers.
    return max(32 << 20, capacity - (16 << 20))


def _choose_bm(B, block_m, sub):
    """Pick rows-per-step minimizing padded rows (multiple of 128 when B>=128)."""
    if B <= 128:
        return _round_up(max(B, sub), sub)   # single grid step
    block_m = max(128, (block_m // 128) * 128)
    best_bm, best_rows = 128, _round_up(B, 128)
    bm = 128
    while bm <= block_m:
        rows = _round_up(B, bm)
        if rows <= best_rows:                # tie-break toward larger tile
            best_bm, best_rows = bm, rows
        bm += 128
    return best_bm


@functools.partial(
    jax.jit,
    static_argnames=("head", "block_m", "stream_block_k", "force_stream"))
def _projection_head_impl(h, w1_p, b1_p, w2_p, b2_p, *, head, block_m,
                          stream_block_k, force_stream):
    B, E = h.shape
    E_p = w1_p.shape[0]
    H_p = w2_p.shape[1]
    out_dtype = h.dtype
    wdtype = w1_p.dtype
    wbytes = jnp.dtype(wdtype).itemsize
    obytes = jnp.dtype(out_dtype).itemsize

    sub = 8 if wbytes >= 4 else 16
    bm = _choose_bm(B, block_m, sub)
    B_p = _round_up(B, bm)
    n_m = B_p // bm

    # Only the activations are padded per call; weights were padded at init.
    h_p = jnp.pad(h, ((0, B_p - B), (0, E_p - E))).astype(wdtype)

    budget = _vmem_budget_bytes()

    # ---- plan A: weights fully VMEM-resident (single-buffered) -------------
    resident_need = (
        E_p * E_p * wbytes + E_p * H_p * wbytes        # W1, W2 (1 buffer each)
        + (E_p + H_p) * 4                              # biases
        + 2 * bm * E_p * wbytes                        # h tile, double-buffered
        + 2 * bm * H_p * obytes                        # out tile, double-buffered
        + bm * E_p * 4 + bm * H_p * 4                  # f32 intermediates
    )

    if (not force_stream) and resident_need + (2 << 20) <= budget:
        cost = pl.CostEstimate(
            flops=2 * B_p * E_p * (E_p + H_p),
            transcendentals=0,
            bytes_accessed=(B_p * E_p * wbytes + E_p * E_p * wbytes
                            + E_p * H_p * wbytes + B_p * H_p * obytes),
        )
        out_p = pl.pallas_call(
            _proj_head_resident_kernel,
            out_shape=jax.ShapeDtypeStruct((B_p, H_p), out_dtype),
            grid_spec=pltpu.PrefetchScalarGridSpec(
                num_scalar_prefetch=0,
                grid=(n_m,),
                in_specs=[
                    pl.BlockSpec((bm, E_p), lambda i: (i, 0)),        # h tile
                    pl.BlockSpec((E_p, E_p), lambda i: (0, 0),
                                 pipeline_mode=pl.Buffered(1)),       # W1 resident
                    pl.BlockSpec((1, E_p), lambda i: (0, 0),
                                 pipeline_mode=pl.Buffered(1)),       # b1
                    pl.BlockSpec((E_p, H_p), lambda i: (0, 0),
                                 pipeline_mode=pl.Buffered(1)),       # W2 resident
                    pl.BlockSpec((1, H_p), lambda i: (0, 0),
                                 pipeline_mode=pl.Buffered(1)),       # b2
                ],
                out_specs=pl.BlockSpec((bm, H_p), lambda i: (i, 0)),
            ),
            compiler_params=pltpu.CompilerParams(
                dimension_semantics=("parallel",),
                vmem_limit_bytes=int(min(resident_need + (8 << 20), budget)),
            ),
            cost_estimate=cost,
        )(h_p, w1_p, b1_p, w2_p, b2_p)
        return out_p[:B, :head]

    # ---- plan B: K-streaming over the hidden axis (large E / small VMEM) ---
    tk = max(128, min((stream_block_k // 128) * 128, E_p))
    while E_p % tk != 0:                      # keep an exact divisor of E_p
        tk -= 128
    n_k = E_p // tk

    stream_need = (
        2 * E_p * tk * wbytes + 2 * tk * H_p * wbytes  # W1 col / W2 row blocks
        + 2 * tk * 4 + H_p * 4                         # bias blocks
        + 2 * bm * E_p * wbytes                        # h tile
        + 2 * bm * H_p * obytes                        # out tile
        + bm * H_p * 4 + bm * tk * 4                   # acc + h1 intermediates
    )
    cost = pl.CostEstimate(
        flops=2 * B_p * E_p * (E_p + H_p),
        transcendentals=0,
        bytes_accessed=(B_p * E_p * wbytes
                        + n_m * (E_p * E_p + E_p * H_p) * wbytes
                        + B_p * H_p * obytes),
    )
    out_p = pl.pallas_call(
        _proj_head_stream_kernel,
        out_shape=jax.ShapeDtypeStruct((B_p, H_p), out_dtype),
        grid_spec=pltpu.PrefetchScalarGridSpec(
            num_scalar_prefetch=0,
            grid=(n_m, n_k),
            in_specs=[
                pl.BlockSpec((bm, E_p), lambda i, k: (i, 0)),   # h tile (per M)
                pl.BlockSpec((E_p, tk), lambda i, k: (0, k)),   # W1 column block
                pl.BlockSpec((1, tk), lambda i, k: (0, k)),     # b1 block
                pl.BlockSpec((tk, H_p), lambda i, k: (k, 0)),   # W2 row block
                pl.BlockSpec((1, H_p), lambda i, k: (0, 0),
                             pipeline_mode=pl.Buffered(1)),     # b2
            ],
            out_specs=pl.BlockSpec((bm, H_p), lambda i, k: (i, 0)),
            scratch_shapes=[pltpu.VMEM((bm, H_p), jnp.float32)],
        ),
        compiler_params=pltpu.CompilerParams(
            dimension_semantics=("parallel", "arbitrary"),
            vmem_limit_bytes=int(min(stream_need + (8 << 20), budget)),
        ),
        cost_estimate=cost,
    )(h_p, w1_p, b1_p, w2_p, b2_p)
    return out_p[:B, :head]


def projection_head(h, params, *, block_m=256, stream_block_k=512,
                    force_stream=False):
    """h: [B, E]; params from prepare_projection_head_params -> [B, head]."""
    return _projection_head_impl(
        h, params.w1, params.b1, params.w2, params.b2,
        head=params.head, block_m=block_m,
        stream_block_k=stream_block_k, force_stream=force_stream)


# ----------------------------------------------------------------------------
# Init + reference
# ----------------------------------------------------------------------------
def init_projection_head_params(key, emb_size, head_size, dtype=jnp.float32):
    """Deterministic init mimicking PyTorch nn.Linear default; [in, out] layout."""
    k1, k2, k3, k4 = jax.random.split(key, 4)
    bound = 1.0 / (emb_size ** 0.5)
    w1 = jax.random.uniform(k1, (emb_size, emb_size), dtype, -bound, bound)
    b1 = jax.random.uniform(k2, (emb_size,), dtype, -bound, bound)
    w2 = jax.random.uniform(k3, (emb_size, head_size), dtype, -bound, bound)
    b2 = jax.random.uniform(k4, (head_size,), dtype, -bound, bound)
    return w1, b1, w2, b2


def _reference(h, w1, b1, w2, b2, compute_dtype=jnp.float32):
    hc = h.astype(compute_dtype)
    h1 = jnp.dot(hc, w1.astype(compute_dtype),
                 preferred_element_type=jnp.float32) + b1
    h1 = jnp.maximum(h1, 0.0)
    out = jnp.dot(h1.astype(compute_dtype), w2.astype(compute_dtype),
                  preferred_element_type=jnp.float32) + b2
    return out.astype(h.dtype)


if __name__ == "__main__":
    key = jax.random.PRNGKey(0)
    k_x, k_p, k_x2, k_p2, k_x3, k_p3 = jax.random.split(key, 6)

    # 1) Small shapes consistent with the module (batch=8, emb=32, head=64),
    #    f32 compute path, tight tolerance.
    B, EMB, HEAD = 8, 32, 64
    h = jax.random.normal(k_x, (B, EMB), jnp.float32)
    raw = init_projection_head_params(k_p, EMB, HEAD)
    params_f32 = prepare_projection_head_params(*raw, compute_dtype=jnp.float32)
    out = jax.block_until_ready(projection_head(h, params_f32))
    ref = _reference(h, *raw, compute_dtype=jnp.float32)
    assert out.shape == (B, HEAD)
    assert jnp.allclose(out, ref, atol=1e-5, rtol=1e-5)

    # 2) Larger / awkward shapes exercising M-tiling + padding, default bf16
    #    compute (weight-resident path).
    B2, EMB2, HEAD2 = 520, 200, 512
    h2 = jax.random.normal(k_x2, (B2, EMB2), jnp.float32)
    raw2 = init_projection_head_params(k_p2, EMB2, HEAD2)
    params_bf16 = prepare_projection_head_params(*raw2)        # bf16 default
    out2 = jax.block_until_ready(projection_head(h2, params_bf16))
    ref2 = _reference(h2, *raw2, compute_dtype=jnp.bfloat16)
    assert out2.shape == (B2, HEAD2)
    assert jnp.allclose(out2, ref2, atol=2e-2, rtol=2e-2)

    # 3) Force the K-streaming fallback (f32) to validate the accumulator path
    #    used when weights do not fit in VMEM (e.g. large E on v7x).
    B3, EMB3, HEAD3 = 260, 512, 384
    h3 = jax.random.normal(k_x3, (B3, EMB3), jnp.float32)
    raw3 = init_projection_head_params(k_p3, EMB3, HEAD3)
    params3 = prepare_projection_head_params(*raw3, compute_dtype=jnp.float32)
    out3 = jax.block_until_ready(
        projection_head(h3, params3, force_stream=True, stream_block_k=128))
    ref3 = _reference(h3, *raw3, compute_dtype=jnp.float32)
    assert out3.shape == (B3, HEAD3)
    assert jnp.allclose(out3, ref3, atol=1e-3, rtol=1e-3)

    print("KERNEL_OK")
</pallas_src>

<mosaic_0001>
module attributes {stable_mosaic.version = 11 : i64} {
  func.func @_proj_head_resident_kernel(%arg0: i32, %arg1: memref<8x128xf32, #tpu.memory_space<vmem>>, %arg2: memref<128x128xf32, #tpu.memory_space<vmem>>, %arg3: memref<1x128xf32, #tpu.memory_space<vmem>>, %arg4: memref<128x128xf32, #tpu.memory_space<vmem>>, %arg5: memref<1x128xf32, #tpu.memory_space<vmem>>, %arg6: memref<8x128xf32, #tpu.memory_space<vmem>>) attributes {dimension_semantics = [#tpu.dimension_semantics<parallel>], iteration_bounds = array<i64: 1>, scalar_prefetch = 0 : i64, scratch_operands = 0 : i64, tpu.core_type = #tpu.core_type<tc>, window_params = [{transform_indices = @transform_0, window_bounds = array<i64: 8, 128>}, {pipeline_mode = #tpu.pipeline_mode<synchronous>, transform_indices = @transform_1, window_bounds = array<i64: 128, 128>}, {pipeline_mode = #tpu.pipeline_mode<synchronous>, transform_indices = @transform_2, window_bounds = array<i64: 1, 128>}, {pipeline_mode = #tpu.pipeline_mode<synchronous>, transform_indices = @transform_3, window_bounds = array<i64: 128, 128>}, {pipeline_mode = #tpu.pipeline_mode<synchronous>, transform_indices = @transform_4, window_bounds = array<i64: 1, 128>}, {transform_indices = @transform_5, window_bounds = array<i64: 8, 128>}]} {
    %c0 = arith.constant 0 : index
    %c0_0 = arith.constant 0 : index
    %0 = vector.load %arg1[%c0, %c0_0] : memref<8x128xf32, #tpu.memory_space<vmem>>, vector<8x128xf32>
    %c0_1 = arith.constant 0 : index
    %c0_2 = arith.constant 0 : index
    %1 = vector.load %arg2[%c0_1, %c0_2] : memref<128x128xf32, #tpu.memory_space<vmem>>, vector<128x128xf32>
    %cst = arith.constant dense<0.000000e+00> : vector<8x128xf32>
    %2 = tpu.matmul %0, %1, %cst {dimension_numbers = #tpu.dot_dimension_numbers<[1], [0], [0], [1], [0, 0, 1, 1], [], []>} : vector<8x128xf32>, vector<128x128xf32>, vector<8x128xf32> -> vector<8x128xf32>
    %c0_3 = arith.constant 0 : index
    %c0_4 = arith.constant 0 : index
    %3 = vector.load %arg3[%c0_3, %c0_4] : memref<1x128xf32, #tpu.memory_space<vmem>>, vector<1x128xf32>
    %4 = vector.broadcast %3 : vector<1x128xf32> to vector<8x128xf32>
    %5 = arith.addf %2, %4 : vector<8x128xf32>
    %cst_5 = arith.constant 0.000000e+00 : f32
    %6 = vector.broadcast %cst_5 : f32 to vector<8x128xf32>
    %7 = arith.maximumf %5, %6 : vector<8x128xf32>
    %c0_6 = arith.constant 0 : index
    %c0_7 = arith.constant 0 : index
    %8 = vector.load %arg4[%c0_6, %c0_7] : memref<128x128xf32, #tpu.memory_space<vmem>>, vector<128x128xf32>
    %cst_8 = arith.constant dense<0.000000e+00> : vector<8x128xf32>
    %9 = tpu.matmul %7, %8, %cst_8 {dimension_numbers = #tpu.dot_dimension_numbers<[1], [0], [0], [1], [0, 0, 1, 1], [], []>} : vector<8x128xf32>, vector<128x128xf32>, vector<8x128xf32> -> vector<8x128xf32>
    %c0_9 = arith.constant 0 : index
    %c0_10 = arith.constant 0 : index
    %10 = vector.load %arg5[%c0_9, %c0_10] : memref<1x128xf32, #tpu.memory_space<vmem>>, vector<1x128xf32>
    %11 = vector.broadcast %10 : vector<1x128xf32> to vector<8x128xf32>
    %12 = arith.addf %9, %11 : vector<8x128xf32>
    %c0_11 = arith.constant 0 : index
    %c0_12 = arith.constant 0 : index
    %13 = vector.load %arg6[%c0_11, %c0_12] : memref<8x128xf32, #tpu.memory_space<vmem>>, vector<8x128xf32>
    tpu.vector_store %arg6[%c0_11, %c0_12], %12 {strides = array<i32>} : memref<8x128xf32, #tpu.memory_space<vmem>>, vector<8x128xf32>,
    return
  }
  func.func @transform_0(%arg0: i32) -> (i32, i32) {
    %c0_i32 = arith.constant 0 : i32
    %c0_i32_0 = arith.constant 0 : i32
    return %arg0, %c0_i32 : i32, i32
  }
  func.func @transform_1(%arg0: i32) -> (i32, i32) {
    %c0_i32 = arith.constant 0 : i32
    %c0_i32_0 = arith.constant 0 : i32
    %c0_i32_1 = arith.constant 0 : i32
    return %c0_i32, %c0_i32_0 : i32, i32
  }
  func.func @transform_2(%arg0: i32) -> (i32, i32) {
    %c0_i32 = arith.constant 0 : i32
    %c0_i32_0 = arith.constant 0 : i32
    %c0_i32_1 = arith.constant 0 : i32
    return %c0_i32, %c0_i32_0 : i32, i32
  }
  func.func @transform_3(%arg0: i32) -> (i32, i32) {
    %c0_i32 = arith.constant 0 : i32
    %c0_i32_0 = arith.constant 0 : i32
    %c0_i32_1 = arith.constant 0 : i32
    return %c0_i32, %c0_i32_0 : i32, i32
  }
  func.func @transform_4(%arg0: i32) -> (i32, i32) {
    %c0_i32 = arith.constant 0 : i32
    %c0_i32_0 = arith.constant 0 : i32
    %c0_i32_1 = arith.constant 0 : i32
    return %c0_i32, %c0_i32_0 : i32, i32
  }
  func.func @transform_5(%arg0: i32) -> (i32, i32) {
    %c0_i32 = arith.constant 0 : i32
    %c0_i32_0 = arith.constant 0 : i32
    return %arg0, %c0_i32 : i32, i32
  }
}

</mosaic_0001>

<bundles_post_ra>
// kernel: _projection_head_impl.1
= control target key start
LH: loop header
LB: loop body
LE: loop exit
PB: predicated region body
PF: predicated region fallthrough
CT: control target
= control target key end

     0   :  { %10 = vsyncpa [#allocation3], 0  ;;  %s587_s0 = inlined_call_operand.vmem [shape: f32[8,128], index: 0, kind: input, shape index: {}]   ;;  %s588_s1 = inlined_call_operand.hbm [shape: f32[128,128], index: 1, kind: input, shape index: {}]   ;;  %s589_s2 = inlined_call_operand.vmem [shape: f32[1,128], index: 2, kind: input, shape index: {}]   ;;  %s590_s3 = inlined_call_operand.hbm [shape: f32[128,128], index: 3, kind: input, shape index: {}]   ;;  %s591_s4 = inlined_call_operand.vmem [shape: f32[1,128], index: 4, kind: input, shape index: {}]   ;;  %s592_s5 = inlined_call_operand.hbm [shape: f32[8,128], index: 5, kind: output, shape index: {}]  }
   0x1   :  { %11 = vsyncpa [#allocation6], 0 }
   0x2   :  { %12 = vsyncpa [#allocation4], 0  ;;  %s488_s18 = smov [#allocation2]   ;;  %s416_s22 = scalar_lea.hbm %s588_s1, 2048 }
   0x3   :  { %s20_s19 = sshll.u32 %s488_s18, 4  ;;  %p417_p0 = scmp.ne.s32.totalorder %s588_s1, %s416_s22  ;;  %s21_s19 = int_to_ptr.vmem [resolvable:$true] %s20_s19 }
   0x4   :  { %p420_p1 = scmp.lt.u32.totalorder %s416_s22, %s588_s1 }
   0x6   :  { %p422_p2 = pnand %p420_p1, %p417_p0 }
   0x8   :  { %425 = shalt.err (!%p422_p2)
}
   0x9   :  { %s426_s27 = scalar_lea.vmem %s21_s19, 2048  ;;  %p431_p4 = scmp.lt.s32.totalorder %s21_s19, %s21_s19 }
   0xa   :  { %p427_p3 = scmp.ne.s32.totalorder %s21_s19, %s426_s27  ;;  %p432_p5 = scmp.lt.s32.totalorder %s426_s27, %s426_s27 }
   0xc   :  { %p433_p6 = por %p432_p5, %p431_p4 }
   0xe   :  { %p434_p7 = pnand %p433_p6, %p427_p3 }
  0x10   :  { %437 = shalt.err (!%p434_p7)
}
  0x11   :  { %s489_s28 = smov 128   ;;  %s490_s29 = smov 8  }
  0x12   :  { %26 = dma.hbm_to_vmem [thread:$0]  %s588_s1, 2048, %s21_s19, [#allocation3], %s489_s28, %s489_s28, %s490_s29  }
  0x13   :  { %s491_s7 = smov [#allocation5]   ;;  %s438_s11 = scalar_lea.hbm %s590_s3, 2048 }
  0x14   :  { %s34_s8 = sshll.u32 %s491_s7, 4  ;;  %p439_p8 = scmp.ne.s32.totalorder %s590_s3, %s438_s11  ;;  %s35_s8 = int_to_ptr.vmem [resolvable:$true] %s34_s8 }
  0x15   :  { %p442_p9 = scmp.lt.u32.totalorder %s438_s11, %s590_s3 }
  0x17   :  { %p444_p10 = pnand %p442_p9, %p439_p8 }
  0x19   :  { %447 = shalt.err (!%p444_p10)
}
  0x1a   :  { %s448_s16 = scalar_lea.vmem %s35_s8, 2048  ;;  %p453_p12 = scmp.lt.s32.totalorder %s35_s8, %s35_s8 }
  0x1b   :  { %p449_p11 = scmp.ne.s32.totalorder %s35_s8, %s448_s16  ;;  %p454_p13 = scmp.lt.s32.totalorder %s448_s16, %s448_s16 }
  0x1d   :  { %p455_p0 = por %p454_p13, %p453_p12 }
  0x1f   :  { %p456_p1 = pnand %p455_p0, %p449_p11 }
  0x21   :  { %459 = shalt.err (!%p456_p1)
}
  0x22   :  { %40 = dma.hbm_to_vmem [thread:$0]  %s590_s3, 2048, %s35_s8, [#allocation6], %s489_s28, %s489_s28, %s490_s29  }
  0x23   :  { %482 = dma.done.wait [#allocation3], 2048  }
  0x24   :  { %483 = vsyncadd [#allocation3], 4294965248 }
  0x25   :  { %484 = dma.done.wait [#allocation6], 2048  }
  0x26   :  { %485 = vsyncadd [#allocation6], 4294965248  ;;  %v492_v0 = vmov 0.0|0.0   ;;  %vm493_vm0 = vmmov 0   ;;  %v494_v1 = vmov 0.0   ;;  %v50_v2 = vld [vmem:[#allocation2] sm:$0xff] }
  0x27   :  { %360 = vmatprep.subr.bf16.mxu0 %v492_v0  ;;  %322 = vmatprep.mubr.msk.f32.mxu0 %vm493_vm0, %v494_v1  ;;  %v51_v3 = vld [vmem:[#allocation2 + $0x8] sm:$0xff]  ;;  %v52_v4 = vld [vmem:[#allocation2 + $0x10] sm:$0xff]  ;;  %v53_v6 = vld [vmem:[#allocation2 + $0x18] sm:$0xff] }
  0x28   :  { %384 = vmatprep.subr.bf16.mxu1 %v492_v0  ;;  %357 = vmatprep.mubr.msk.f32.mxu1 %vm493_vm0, %v494_v1  ;;  %v361_v5 = vpack.c.bf16 %v51_v3, %v50_v2  ;;  %v364_v7 = vpack.c.bf16 %v53_v6, %v52_v4  ;;  %v54_v8 = vld [vmem:[#allocation2 + $0x20] sm:$0xff]  ;;  %v55_v9 = vld [vmem:[#allocation2 + $0x28] sm:$0xff]  ;;  %v146_v12 = vld [vmem:[#allocation5 + $0x10] sm:$0xff] }
  0x29   :  { %v144_v10 = vld [vmem:[#allocation5] sm:$0xff]  ;;  %v145_v11 = vld [vmem:[#allocation5 + $0x8] sm:$0xff]  ;;  %v147_v13 = vld [vmem:[#allocation5 + $0x18] sm:$0xff]  ;;  %v367_v14 = vpack.c.bf16 %v55_v9, %v54_v8 }
  0x2a   :  { %362 = vmatpush3.bf16.msra.mxu0 %v361_v5  ;;  %v385_v15 = vpack.c.bf16 %v145_v11, %v144_v10  ;;  %v56_v16 = vld [vmem:[#allocation2 + $0x30] sm:$0xff]  ;;  %v57_v17 = vld [vmem:[#allocation2 + $0x38] sm:$0xff]  ;;  %v388_v18 = vpack.c.bf16 %v147_v13, %v146_v12  ;;  %v148_v19 = vld [vmem:[#allocation5 + $0x20] sm:$0xff] }
  0x2b   :  { %363 = vmatprep.subr.bf16.mxu0 %v492_v0  ;;  %v149_v20 = vld [vmem:[#allocation5 + $0x28] sm:$0xff]  ;;  %v370_v21 = vpack.c.bf16 %v57_v17, %v56_v16  ;;  %v58_v22 = vld [vmem:[#allocation2 + $0x40] sm:$0xff]  ;;  %v150_v25 = vld [vmem:[#allocation5 + $0x30] sm:$0xff] }
  0x2c   :  { %386 = vmatpush3.bf16.msra.mxu1 %v385_v15  ;;  %v59_v23 = vld [vmem:[#allocation2 + $0x48] sm:$0xff]  ;;  %v391_v24 = vpack.c.bf16 %v149_v20, %v148_v19  ;;  %v151_v26 = vld [vmem:[#allocation5 + $0x38] sm:$0xff]  ;;  %v60_v28 = vld [vmem:[#allocation2 + $0x50] sm:$0xff] }
  0x2d   :  { %387 = vmatprep.subr.bf16.mxu1 %v492_v0  ;;  %v373_v27 = vpack.c.bf16 %v59_v23, %v58_v22  ;;  %v61_v29 = vld [vmem:[#allocation2 + $0x58] sm:$0xff]  ;;  %v394_v30 = vpack.c.bf16 %v151_v26, %v150_v25  ;;  %v152_v31 = vld [vmem:[#allocation5 + $0x40] sm:$0xff]  ;;  %v153_v32 = vld [vmem:[#allocation5 + $0x48] sm:$0xff] }
  0x2e   :  { %365 = vmatpush3.bf16.msra.mxu0 %v364_v7  ;;  %v376_v33 = vpack.c.bf16 %v61_v29, %v60_v28  ;;  %v62_v34 = vld [vmem:[#allocation2 + $0x60] sm:$0xff]  ;;  %v63_v35 = vld [vmem:[#allocation2 + $0x68] sm:$0xff]  ;;  %v397_v36 = vpack.c.bf16 %v153_v32, %v152_v31  ;;  %v154_v37 = vld [vmem:[#allocation5 + $0x50] sm:$0xff] }
  0x2f   :  { %366 = vmatprep.subr.bf16.mxu0 %v492_v0  ;;  %v155_v38 = vld [vmem:[#allocation5 + $0x58] sm:$0xff]  ;;  %v379_v39 = vpack.c.bf16 %v63_v35, %v62_v34  ;;  %v64_v40 = vld [vmem:[#allocation2 + $0x70] sm:$0xff]  ;;  %v156_v43 = vld [vmem:[#allocation5 + $0x60] sm:$0xff] }
  0x30   :  { %389 = vmatpush3.bf16.msra.mxu1 %v388_v18  ;;  %v65_v41 = vld [vmem:[#allocation2 + $0x78] sm:$0xff]  ;;  %v400_v42 = vpack.c.bf16 %v155_v38, %v154_v37  ;;  %v157_v44 = vld [vmem:[#allocation5 + $0x68] sm:$0xff]  ;;  %v158_v48 = vld [vmem:[#allocation5 + $0x70] sm:$0xff] }
  0x31   :  { %390 = vmatprep.subr.bf16.mxu1 %v492_v0  ;;  %v382_v45 = vpack.c.bf16 %v65_v41, %v64_v40  ;;  %v403_v46 = vpack.c.bf16 %v157_v44, %v156_v43  ;;  %v49_v47 = vld [vmem:[%s587_s0] sm:$0xff]  ;;  %s495_s0 = smov [#allocation7]  }
  0x32   :  { %368 = vmatpush3.bf16.msra.mxu0 %v367_v14  ;;  %v159_v49 = vld [vmem:[#allocation5 + $0x78] sm:$0xff]  ;;  %s244_s23 = sshll.u32 %s495_s0, 4  ;;  %s245_s23 = int_to_ptr.vmem [resolvable:$true] %s244_s23 }
  0x33   :  { %369 = vmatprep.subr.bf16.mxu0 %v492_v0  ;;  %v406_v50 = vpack.c.bf16 %v159_v49, %v158_v48  ;;  %v254_v51 = vld [vmem:[%s589_s2] ss:$0 sm:$0xff]  ;;  %s460_s24 = scalar_lea.vmem %s245_s23, 128  ;;  %p465_p3 = scmp.lt.s32.totalorder %s245_s23, %s245_s23 }
  0x34   :  { %392 = vmatpush3.bf16.msra.mxu1 %v391_v24  ;;  %v255_v56 = vld [vmem:[%s591_s4] ss:$0 sm:$0xff]  ;;  %p461_p2 = scmp.ne.s32.totalorder %s245_s23, %s460_s24  ;;  %p466_p4 = scmp.lt.s32.totalorder %s460_s24, %s460_s24 }
  0x35   :  { %393 = vmatprep.subr.bf16.mxu1 %v492_v0 }
  0x36   :  { %371 = vmatpush3.bf16.msra.mxu0 %v370_v21  ;;  %p467_p5 = por %p466_p4, %p465_p3 }
  0x37   :  { %372 = vmatprep.subr.bf16.mxu0 %v492_v0 }
  0x38   :  { %395 = vmatpush3.bf16.msra.mxu1 %v394_v30  ;;  %p468_p6 = pnand %p467_p5, %p461_p2 }
  0x39   :  { %396 = vmatprep.subr.bf16.mxu1 %v492_v0 }
  0x3a   :  { %374 = vmatpush3.bf16.msra.mxu0 %v373_v27 }
  0x3b   :  { %375 = vmatprep.subr.bf16.mxu0 %v492_v0 }
  0x3c   :  { %398 = vmatpush3.bf16.msra.mxu1 %v397_v36 }
  0x3d   :  { %399 = vmatprep.subr.bf16.mxu1 %v492_v0 }
  0x3e   :  { %377 = vmatpush3.bf16.msra.mxu0 %v376_v33 }
  0x3f   :  { %378 = vmatprep.subr.bf16.mxu0 %v492_v0 }
  0x40   :  { %401 = vmatpush3.bf16.msra.mxu1 %v400_v42 }
  0x41   :  { %402 = vmatprep.subr.bf16.mxu1 %v492_v0 }
  0x42   :  { %380 = vmatpush3.bf16.msra.mxu0 %v379_v39 }
  0x43   :  { %381 = vmatprep.subr.bf16.mxu0 %v492_v0 }
  0x44   :  { %404 = vmatpush3.bf16.msra.mxu1 %v403_v46 }
  0x45   :  { %405 = vmatprep.subr.bf16.mxu1 %v492_v0 }
  0x46   :  { %383 = vmatpush3.bf16.msra.mxu0 %v382_v45 }
  0x48   :  { %407 = vmatpush3.bf16.msra.mxu1 %v406_v50 }
  0x49   :  { %323 = vmatmul.mubr.f32.vlgmr.msra.gmra.mrb[0].mxu0 %v49_v47 }
 0x11c   :  { %v139_v52 = vpop.f32.mrb[0].mxu0 }
 0x11d   :  { %v140_v53 = vadd.f32 %v254_v51, %v139_v52  ;;  %v324_v54 = vpop.f32.mrb[1].mxu0 }
 0x11f   :  { %v143_v55 = vmax.f32 %v140_v53, 0.0 }
 0x121   :  { %358 = vmatmul.mubr.f32.vlgmr.msra.gmra.mrb[0].mxu1 %v143_v55 }
 0x1f4   :  { %v233_v57 = vpop.f32.mrb[0].mxu1 }
 0x1f5   :  { %v234_v58 = vadd.f32 %v255_v56, %v233_v57  ;;  %v359_v59 = vpop.f32.mrb[1].mxu1 }
 0x1f7   :  { %237 = vst [vmem:[#allocation7] sm:$0xff] %v234_v58 }
 0x1f8   :  { %471 = shalt.err (!%p468_p6)
}
 0x1f9   :  { %s472_s26 = scalar_lea.hbm %s592_s5, 128 }
 0x1fa   :  { %p473_p7 = scmp.ne.s32.totalorder %s592_s5, %s472_s26  ;;  %p476_p8 = scmp.lt.u32.totalorder %s472_s26, %s592_s5 }
 0x1fc   :  { %p478_p9 = pnand %p476_p8, %p473_p7 }
 0x1fe   :  { %481 = shalt.err (!%p478_p9)
}
 0x1ff   :  { %247 = dma.vmem_to_hbm [thread:$0]  %s245_s23, 128, %s592_s5, [#allocation4]  }
 0x200   :  { %486 = dma.done.wait [#allocation4], 128  }
 0x201   :  { %487 = vsyncadd [#allocation4], 4294967168 }
 0x202   :  { %251 = vsyncpa [#allocation3], 1 }
 0x203   :  { %252 = vsyncpa [#allocation6], 1 }
 0x204   :  { %253 = vsyncpa [#allocation4], 1 }

</bundles_post_ra>
